<compile_context>
chip_gen: v5e
topology: v5e:2x2
jax: 0.10.0
libtpu: 0.0.40
codegen_flags: <defaults>
</compile_context>

<pallas_src>
import functools

import jax
import jax.numpy as jnp
from jax.experimental import pallas as pl
from jax.experimental.pallas import tpu as pltpu


# ------------------------------ helpers --------------------------------------

def _round_up(x, m):
    return ((x + m - 1) // m) * m


def _vmem_limit_bytes():
    """Generation-aware scoped-VMEM limit (v7x: 64 MiB physical; v5e/v6e: 128 MiB)."""
    cap = None
    try:
        cap = getattr(pltpu.get_tpu_info(), "vmem_capacity_bytes", None)
    except Exception:
        cap = None
    if not cap:
        cap = 64 * 1024 * 1024                 # conservative fallback (v7x physical)
    return min(int(cap * 3 // 4), 100 * 1024 * 1024)


def _pick_q_tile(Q, C, in_itemsize, tile_budget_bytes, max_tile_cap=4096):
    """Pick a Q tile (multiple of 8) sized by VMEM bytes; prefer exact divisors of Q
    so no host-side logits pad (an extra HBM pass) is needed."""
    # Per-row VMEM: double-buffered logits + ~6 live f32 [TQ, C] temporaries + tgt.
    per_row = C * (2 * in_itemsize + 6 * 4) + 2 * 4
    max_tile = min(max(8, tile_budget_bytes // per_row), max_tile_cap)
    max_tile = max(8, (max_tile // 8) * 8)
    if Q <= max_tile:
        qp = _round_up(Q, 8)
        return qp, qp                          # single tile
    if Q % 8 == 0:
        t = max_tile
        while t >= 64:
            if Q % t == 0:
                return t, Q                    # exact divisor, no padding
            t -= 8
    return max_tile, _round_up(Q, max_tile)    # fall back to padding


# ------------------------------ fused kernel ----------------------------------

def _owl_loss_kernel(logits_ref, tgt_ref, w_ref, sb_ref, tb_ref, part_ref, *,
                     num_classes, num_boxes):
    """Per-tile partial sums for the fused OWL-ViT criterion.

    logits_ref : [TQ, C]    logits block in native dtype
    tgt_ref    : [TQ, 1]    i32 target class (C = background, -1 = Q padding)
    w_ref      : [1, C]     f32 per-class BCE weight (resident)
    sb_ref     : [4, Mp]    f32 matched pred boxes, lane-dense (resident)
    tb_ref     : [4, Mp]    f32 matched target boxes, lane-dense (resident)
    part_ref   : [1, 8, 128] f32 per-tile partials; lane k (replicated on sublanes):
        0 pos_sum, 1 pos_cnt, 2 neg_sum, 3 neg_cnt, 4 non_empty_count,
        5 loss_bbox (tile 0 only), 6 loss_giou (tile 0 only)
    """
    C = num_classes
    x = logits_ref[...].astype(jnp.float32)                       # [TQ, C]
    tgt = tgt_ref[...]                                            # [TQ, 1] i32

    # BCE-with-logits via a single softplus:
    #   -(y*log(sigmoid(x)) + (1-y)*log(1-sigmoid(x))) = softplus(x) - y*x
    # The single min reproduces torch.BCELoss's -100 clamp on the log terms.
    sp = jnp.maximum(x, 0.0) + jnp.log(1.0 + jnp.exp(-jnp.abs(x)))
    col = jax.lax.broadcasted_iota(jnp.int32, x.shape, 1)         # [TQ, C]
    onehot = (col == tgt).astype(jnp.float32)                     # bg/pad rows -> all 0
    bce = jnp.minimum(sp - onehot * x, 100.0) * w_ref[...]
    focal = jnp.square(1.0 - jnp.exp(-bce)) * bce
    per_q = jnp.sum(focal, axis=1, keepdims=True)                 # [TQ, 1]

    is_pos = jnp.logical_and(tgt >= 0, tgt < C).astype(jnp.float32)
    is_bg = (tgt == C).astype(jnp.float32)
    valid = (tgt >= 0).astype(jnp.float32)                        # excludes Q padding

    # cardinality: argmax(-1) != C-1  <=>  max over classes [0, C-2] ties-or-beats
    # the last class (torch argmax tie-breaks to the first index).
    fmin = jnp.finfo(jnp.float32).min
    rest_max = jnp.max(jnp.where(col < C - 1, x, fmin), axis=1, keepdims=True)
    last_col = x[:, C - 1:C]                                      # value-level lane slice
    non_empty = jnp.where(rest_max >= last_col, 1.0, 0.0) * valid

    pos_sum = jnp.sum(per_q * is_pos)
    pos_cnt = jnp.sum(is_pos)
    neg_sum = jnp.sum(per_q * is_bg)
    neg_cnt = jnp.sum(is_bg)
    card = jnp.sum(non_empty)

    # Box L1 + GIoU on tiny [4, Mp] resident inputs; contributed by grid step 0
    # only, so the Q axis can be "parallel" (both TensorCores on v7x).
    is_first = jnp.where(pl.program_id(0) == 0, 1.0, 0.0)
    s = sb_ref[...]                                               # [4, Mp]
    t = tb_ref[...]
    l1 = jnp.sum(jnp.abs(s - t)) / num_boxes

    def to_xyxy(b):
        cx, cy, w, h = b[0:1, :], b[1:2, :], b[2:3, :], b[3:4, :]
        return cx - 0.5 * w, cy - 0.5 * h, cx + 0.5 * w, cy + 0.5 * h

    sx0, sy0, sx1, sy1 = to_xyxy(s)
    tx0, ty0, tx1, ty1 = to_xyxy(t)
    area_s = (sx1 - sx0) * (sy1 - sy0)
    area_t = (tx1 - tx0) * (ty1 - ty0)
    iw = jnp.maximum(jnp.minimum(sx1, tx1) - jnp.maximum(sx0, tx0), 0.0)
    ih = jnp.maximum(jnp.minimum(sy1, ty1) - jnp.maximum(sy0, ty0), 0.0)
    inter = iw * ih
    union = area_s + area_t - inter
    iou = inter / union
    ew = jnp.maximum(sx1, tx1) - jnp.minimum(sx0, tx0)
    eh = jnp.maximum(sy1, ty1) - jnp.minimum(sy0, ty0)
    enclose = ew * eh
    giou = iou - (enclose - union) / enclose
    giou_loss = jnp.sum(1.0 - giou) / num_boxes

    vals = (pos_sum, pos_cnt, neg_sum, neg_cnt, card,
            is_first * l1, is_first * giou_loss)
    lane = jax.lax.broadcasted_iota(jnp.int32, (1, 8, 128), 2)
    blk = jnp.zeros((1, 8, 128), jnp.float32)
    for k, v in enumerate(vals):
        blk = jnp.where(lane == k, v, blk)
    part_ref[...] = blk


# ------------------------------ pallas_call wrapper ---------------------------

def owlvit_loss_fused(logits_2d, target_classes_1d, empty_weight,
                      src_boxes, target_boxes, num_boxes, tgt_len):
    """Run the fused criterion kernel.  Returns
    (loss_ce, loss_bg, cardinality_error, loss_bbox, loss_giou)."""
    Q, C = logits_2d.shape
    in_itemsize = jnp.dtype(logits_2d.dtype).itemsize
    vmem_limit = _vmem_limit_bytes()
    TQ, Qp = _pick_q_tile(Q, C, in_itemsize, int(vmem_limit * 0.85))
    n_tiles = Qp // TQ

    if Qp != Q:
        # Only hit when Q has no usable tile divisor (costs one extra HBM pass).
        logits_2d = jnp.pad(logits_2d, ((0, Qp - Q), (0, 0)))
        target_classes_1d = jnp.pad(target_classes_1d, (0, Qp - Q),
                                    constant_values=-1)

    # Matched boxes transposed to lane-dense [4, Mp]; pad with identical dummy
    # boxes (zero L1 and zero (1 - GIoU) contribution).
    M = int(src_boxes.shape[0])
    Mp = max(128, _round_up(max(M, 1), 128))
    dummy = jnp.tile(jnp.array([[0.5, 0.5, 0.5, 0.5]], jnp.float32), (Mp - M, 1))
    sb = jnp.concatenate([src_boxes.astype(jnp.float32), dummy], axis=0).T
    tb = jnp.concatenate([target_boxes.astype(jnp.float32), dummy], axis=0).T

    kernel = functools.partial(_owl_loss_kernel, num_classes=C,
                               num_boxes=float(num_boxes))

    partials = pl.pallas_call(
        kernel,
        out_shape=jax.ShapeDtypeStruct((n_tiles, 8, 128), jnp.float32),
        grid_spec=pltpu.PrefetchScalarGridSpec(
            num_scalar_prefetch=0,
            grid=(n_tiles,),
            in_specs=[
                pl.BlockSpec((TQ, C), lambda i: (i, 0)),   # logits (native dtype)
                pl.BlockSpec((TQ, 1), lambda i: (i, 0)),   # target classes
                pl.BlockSpec((1, C), lambda i: (0, 0)),    # class weights (resident)
                pl.BlockSpec((4, Mp), lambda i: (0, 0)),   # matched pred boxes
                pl.BlockSpec((4, Mp), lambda i: (0, 0)),   # matched target boxes
            ],
            out_specs=pl.BlockSpec((1, 8, 128), lambda i: (i, 0, 0)),
        ),
        compiler_params=pltpu.CompilerParams(
            dimension_semantics=("parallel",),             # 2 TCs on v7x
            vmem_limit_bytes=vmem_limit,
        ),
    )(logits_2d,
      target_classes_1d.reshape(Qp, 1).astype(jnp.int32),
      empty_weight.reshape(1, C).astype(jnp.float32),
      sb, tb)

    # Trivial final combine (5 scalars) in plain JAX.
    vec = jnp.sum(partials, axis=0)[0]                     # [128]
    loss_ce = vec[0] / vec[1]      # NaN if no positive queries (matches torch .mean())
    loss_bg = vec[2] / vec[3]      # NaN if no background queries (matches reference)
    card_err = jnp.abs(vec[4] - tgt_len)
    return loss_ce, loss_bg, card_err, vec[5], vec[6]


# ------------------------------ criterion wrapper -----------------------------

class OWLVitLossPallas:
    """JAX/Pallas port of the PyTorch OWLVitLoss forward pass."""

    def __init__(self, num_classes, matcher=None, weight_dict=None,
                 eos_coef=0.1, losses_dict=('labels', 'cardinality', 'boxes')):
        self.num_classes = num_classes
        self.matcher = matcher
        self.weight_dict = weight_dict
        self.eos_coef = eos_coef
        self.losses_dict = list(losses_dict)
        self.background_label = num_classes
        # reference: empty_weight = ones(num_classes); empty_weight[0] = eos_coef
        self.empty_weight = jnp.ones((num_classes,), jnp.float32).at[0].set(eos_coef)

    def _default_matcher(self, outputs, targets):
        # TODO(synk): the Hungarian matcher (scipy linear_sum_assignment) is a
        # data-dependent sequential algorithm with no clean Pallas equivalent;
        # identity matching is used when no matcher is supplied.
        return [(jnp.arange(t['class_labels'].shape[0], dtype=jnp.int32),
                 jnp.arange(t['class_labels'].shape[0], dtype=jnp.int32))
                for t in targets]

    def __call__(self, outputs, targets):
        logits = outputs['logits']            # [B, Q, C]
        pred_boxes = outputs['pred_boxes']    # [B, Q, 4]
        B, Q, C = logits.shape
        assert C == self.num_classes
        # The reference loss_labels squeezes dim 0 and uses a boolean mask over
        # queries, which is only well-defined for batch_size == 1.
        assert B == 1, "OWLVitLoss.loss_labels semantics require batch_size == 1"

        if self.matcher is not None:
            indices = self.matcher(outputs, targets)
        else:
            indices = self._default_matcher(outputs, targets)
        num_boxes = float(sum(int(t['class_labels'].shape[0]) for t in targets))
        tgt_len = float(targets[0]['class_labels'].shape[0])

        # target class per query (== num_classes means background); tiny
        # data-dependent scatter stays on the host side.
        target_classes = jnp.full((B, Q), self.background_label, jnp.int32)
        for b, (t, (src, tgt)) in enumerate(zip(targets, indices)):
            target_classes = target_classes.at[b, src].set(
                t['class_labels'][tgt].astype(jnp.int32) - 1)
        # TODO(synk): the reference's torch.save(target_classes, ...) debug dump
        # (file I/O) is intentionally skipped.

        # matched box gathers (tiny, data-dependent) stay in plain JAX
        src_boxes = jnp.concatenate(
            [pred_boxes[b][src] for b, (src, _) in enumerate(indices)], axis=0)
        target_boxes = jnp.concatenate(
            [t['boxes'][tgt] for t, (_, tgt) in zip(targets, indices)], axis=0)

        loss_ce, loss_bg, card_err, loss_bbox, loss_giou = owlvit_loss_fused(
            logits[0], target_classes[0], self.empty_weight,
            src_boxes, target_boxes, num_boxes, tgt_len)

        losses = {}
        if 'labels' in self.losses_dict:
            losses['loss_ce'] = loss_ce
            losses['loss_bg'] = loss_bg
        if 'cardinality' in self.losses_dict:
            losses['cardinality_error'] = card_err
        if 'boxes' in self.losses_dict:
            losses['loss_bbox'] = loss_bbox
            losses['loss_giou'] = loss_giou
        return losses


# ------------------------------------ demo ------------------------------------

if __name__ == "__main__":
    key = jax.random.PRNGKey(0)
    B, Q, C, NT = 1, 16, 8, 3            # batch, queries, classes, target boxes
    k1, k2, k3, k4 = jax.random.split(key, 4)

    logits = jax.random.normal(k1, (B, Q, C), jnp.float32)
    centers = jax.random.uniform(k2, (B, Q, 2), minval=0.3, maxval=0.7)
    sizes = jax.random.uniform(k3, (B, Q, 2), minval=0.1, maxval=0.4)
    pred_boxes = jnp.concatenate([centers, sizes], axis=-1)       # cxcywh

    class_labels = jnp.array([2, 5, 8], jnp.int32)                # 1-indexed in [1, C]
    tcenters = jax.random.uniform(k4, (NT, 2), minval=0.3, maxval=0.7)
    tsizes = jnp.full((NT, 2), 0.2, jnp.float32)
    gt_boxes = jnp.concatenate([tcenters, tsizes], axis=-1)

    outputs = {'logits': logits, 'pred_boxes': pred_boxes}
    targets = [{'class_labels': class_labels, 'boxes': gt_boxes}]

    criterion = OWLVitLossPallas(num_classes=C, eos_coef=0.1,
                                 losses_dict=['labels', 'cardinality', 'boxes'])
    losses = criterion(outputs, targets)
    jax.block_until_ready(losses)
    print("KERNEL_OK")
</pallas_src>

<mosaic_0001>
module attributes {stable_mosaic.version = 11 : i64} {
  func.func @_owl_loss_kernel(%arg0: i32, %arg1: memref<16x8xf32, #tpu.memory_space<vmem>>, %arg2: memref<16x1xi32, #tpu.memory_space<vmem>>, %arg3: memref<1x8xf32, #tpu.memory_space<vmem>>, %arg4: memref<4x128xf32, #tpu.memory_space<vmem>>, %arg5: memref<4x128xf32, #tpu.memory_space<vmem>>, %arg6: memref<1x8x128xf32, #tpu.memory_space<vmem>>) attributes {dimension_semantics = [#tpu.dimension_semantics<parallel>], iteration_bounds = array<i64: 1>, scalar_prefetch = 0 : i64, scratch_operands = 0 : i64, tpu.core_type = #tpu.core_type<tc>, window_params = [{transform_indices = @transform_0, window_bounds = array<i64: 16, 8>}, {transform_indices = @transform_1, window_bounds = array<i64: 16, 1>}, {pipeline_mode = #tpu.pipeline_mode<synchronous>, transform_indices = @transform_2, window_bounds = array<i64: 1, 8>}, {pipeline_mode = #tpu.pipeline_mode<synchronous>, transform_indices = @transform_3, window_bounds = array<i64: 4, 128>}, {pipeline_mode = #tpu.pipeline_mode<synchronous>, transform_indices = @transform_4, window_bounds = array<i64: 4, 128>}, {transform_indices = @transform_5, window_bounds = array<i64: 1, 8, 128>}]} {
    %c0 = arith.constant 0 : index
    %c0_0 = arith.constant 0 : index
    %0 = vector.load %arg1[%c0, %c0_0] : memref<16x8xf32, #tpu.memory_space<vmem>>, vector<16x8xf32>
    %c0_1 = arith.constant 0 : index
    %c0_2 = arith.constant 0 : index
    %1 = vector.load %arg2[%c0_1, %c0_2] : memref<16x1xi32, #tpu.memory_space<vmem>>, vector<16x1xi32>
    %cst = arith.constant 0.000000e+00 : f32
    %2 = vector.broadcast %cst : f32 to vector<16x8xf32>
    %3 = arith.maximumf %0, %2 : vector<16x8xf32>
    %4 = math.absf %0 : vector<16x8xf32>
    %cst_3 = arith.constant 0.000000e+00 : f32
    %5 = vector.broadcast %cst_3 : f32 to vector<16x8xf32>
    %6 = arith.subf %5, %4 : vector<16x8xf32>
    %7 = math.exp %6 : vector<16x8xf32>
    %cst_4 = arith.constant 1.000000e+00 : f32
    %8 = vector.broadcast %cst_4 : f32 to vector<16x8xf32>
    %9 = arith.addf %8, %7 : vector<16x8xf32>
    %10 = math.log %9 : vector<16x8xf32>
    %11 = arith.addf %3, %10 : vector<16x8xf32>
    %12 = tpu.iota {dimensions = array<i32: 1>} : vector<16x8xi32>
    %13 = vector.broadcast %1 : vector<16x1xi32> to vector<16x8xi32>
    %14 = arith.cmpi eq, %12, %13 : vector<16x8xi32>
    %15 = arith.extui %14 : vector<16x8xi1> to vector<16x8xi32>
    %16 = arith.sitofp %15 : vector<16x8xi32> to vector<16x8xf32>
    %17 = arith.mulf %16, %0 : vector<16x8xf32>
    %18 = arith.subf %11, %17 : vector<16x8xf32>
    %cst_5 = arith.constant 1.000000e+02 : f32
    %19 = vector.broadcast %cst_5 : f32 to vector<16x8xf32>
    %20 = arith.minimumf %18, %19 : vector<16x8xf32>
    %c0_6 = arith.constant 0 : index
    %c0_7 = arith.constant 0 : index
    %21 = vector.load %arg3[%c0_6, %c0_7] : memref<1x8xf32, #tpu.memory_space<vmem>>, vector<1x8xf32>
    %22 = vector.broadcast %21 : vector<1x8xf32> to vector<16x8xf32>
    %23 = arith.mulf %20, %22 : vector<16x8xf32>
    %cst_8 = arith.constant 0.000000e+00 : f32
    %24 = vector.broadcast %cst_8 : f32 to vector<16x8xf32>
    %25 = arith.subf %24, %23 : vector<16x8xf32>
    %26 = math.exp %25 : vector<16x8xf32>
    %cst_9 = arith.constant 1.000000e+00 : f32
    %27 = vector.broadcast %cst_9 : f32 to vector<16x8xf32>
    %28 = arith.subf %27, %26 : vector<16x8xf32>
    %29 = arith.mulf %28, %28 : vector<16x8xf32>
    %30 = arith.mulf %29, %23 : vector<16x8xf32>
    %cst_10 = arith.constant dense<0.000000e+00> : vector<16xf32>
    %31 = vector.multi_reduction <add>, %30, %cst_10 [1] : vector<16x8xf32> to vector<16xf32>
    %32 = vector.shape_cast %31 : vector<16xf32> to vector<16x1xf32>
    %c0_i32 = arith.constant 0 : i32
    %33 = vector.broadcast %c0_i32 : i32 to vector<16x1xi32>
    %34 = arith.cmpi sge, %1, %33 : vector<16x1xi32>
    %c8_i32 = arith.constant 8 : i32
    %35 = vector.broadcast %c8_i32 : i32 to vector<16x1xi32>
    %36 = arith.cmpi slt, %1, %35 : vector<16x1xi32>
    %37 = arith.andi %34, %36 : vector<16x1xi1>
    %38 = arith.extui %37 : vector<16x1xi1> to vector<16x1xi32>
    %39 = arith.sitofp %38 : vector<16x1xi32> to vector<16x1xf32>
    %c8_i32_11 = arith.constant 8 : i32
    %40 = vector.broadcast %c8_i32_11 : i32 to vector<16x1xi32>
    %41 = arith.cmpi eq, %1, %40 : vector<16x1xi32>
    %42 = arith.extui %41 : vector<16x1xi1> to vector<16x1xi32>
    %43 = arith.sitofp %42 : vector<16x1xi32> to vector<16x1xf32>
    %c0_i32_12 = arith.constant 0 : i32
    %44 = vector.broadcast %c0_i32_12 : i32 to vector<16x1xi32>
    %45 = arith.cmpi sge, %1, %44 : vector<16x1xi32>
    %46 = arith.extui %45 : vector<16x1xi1> to vector<16x1xi32>
    %47 = arith.sitofp %46 : vector<16x1xi32> to vector<16x1xf32>
    %c7_i32 = arith.constant 7 : i32
    %48 = vector.broadcast %c7_i32 : i32 to vector<16x8xi32>
    %49 = arith.cmpi slt, %12, %48 : vector<16x8xi32>
    %cst_13 = arith.constant -3.40282347E+38 : f32
    %50 = vector.broadcast %cst_13 : f32 to vector<16x8xf32>
    %51 = arith.select %49, %0, %50 : vector<16x8xi1>, vector<16x8xf32>
    %cst_14 = arith.constant dense<0xFF800000> : vector<16xf32>
    %52 = vector.multi_reduction <maximumf>, %51, %cst_14 [1] : vector<16x8xf32> to vector<16xf32>
    %53 = vector.shape_cast %52 : vector<16xf32> to vector<16x1xf32>
    %54 = vector.extract_strided_slice %0 {offsets = [0, 7], sizes = [16, 1], strides = [1, 1]} : vector<16x8xf32> to vector<16x1xf32>
    %55 = arith.cmpf oge, %53, %54 : vector<16x1xf32>
    %cst_15 = arith.constant 1.000000e+00 : f32
    %cst_16 = arith.constant 0.000000e+00 : f32
    %56 = vector.broadcast %cst_15 : f32 to vector<16x1xf32>
    %57 = vector.broadcast %cst_16 : f32 to vector<16x1xf32>
    %58 = arith.select %55, %56, %57 : vector<16x1xi1>, vector<16x1xf32>
    %59 = arith.mulf %58, %47 : vector<16x1xf32>
    %60 = arith.mulf %32, %39 : vector<16x1xf32>
    %61 = vector.shape_cast %60 : vector<16x1xf32> to vector<1x16x1xf32>
    %cst_17 = arith.constant dense<0.000000e+00> : vector<1xf32>
    %62 = vector.multi_reduction <add>, %61, %cst_17 [1, 2] : vector<1x16x1xf32> to vector<1xf32>
    %63 = vector.shape_cast %62 : vector<1xf32> to vector<1x1x1xf32>
    %64 = vector.extract %63[0, 0, 0] : f32 from vector<1x1x1xf32>
    %65 = vector.shape_cast %39 : vector<16x1xf32> to vector<1x16x1xf32>
    %cst_18 = arith.constant dense<0.000000e+00> : vector<1xf32>
    %66 = vector.multi_reduction <add>, %65, %cst_18 [1, 2] : vector<1x16x1xf32> to vector<1xf32>
    %67 = vector.shape_cast %66 : vector<1xf32> to vector<1x1x1xf32>
    %68 = vector.extract %67[0, 0, 0] : f32 from vector<1x1x1xf32>
    %69 = arith.mulf %32, %43 : vector<16x1xf32>
    %70 = vector.shape_cast %69 : vector<16x1xf32> to vector<1x16x1xf32>
    %cst_19 = arith.constant dense<0.000000e+00> : vector<1xf32>
    %71 = vector.multi_reduction <add>, %70, %cst_19 [1, 2] : vector<1x16x1xf32> to vector<1xf32>
    %72 = vector.shape_cast %71 : vector<1xf32> to vector<1x1x1xf32>
    %73 = vector.extract %72[0, 0, 0] : f32 from vector<1x1x1xf32>
    %74 = vector.shape_cast %43 : vector<16x1xf32> to vector<1x16x1xf32>
    %cst_20 = arith.constant dense<0.000000e+00> : vector<1xf32>
    %75 = vector.multi_reduction <add>, %74, %cst_20 [1, 2] : vector<1x16x1xf32> to vector<1xf32>
    %76 = vector.shape_cast %75 : vector<1xf32> to vector<1x1x1xf32>
    %77 = vector.extract %76[0, 0, 0] : f32 from vector<1x1x1xf32>
    %78 = vector.shape_cast %59 : vector<16x1xf32> to vector<1x16x1xf32>
    %cst_21 = arith.constant dense<0.000000e+00> : vector<1xf32>
    %79 = vector.multi_reduction <add>, %78, %cst_21 [1, 2] : vector<1x16x1xf32> to vector<1xf32>
    %80 = vector.shape_cast %79 : vector<1xf32> to vector<1x1x1xf32>
    %81 = vector.extract %80[0, 0, 0] : f32 from vector<1x1x1xf32>
    %c0_i32_22 = arith.constant 0 : i32
    %82 = arith.cmpi eq, %arg0, %c0_i32_22 : i32
    %cst_23 = arith.constant 1.000000e+00 : f32
    %cst_24 = arith.constant 0.000000e+00 : f32
    %83 = arith.select %82, %cst_23, %cst_24 : f32
    %c0_25 = arith.constant 0 : index
    %c0_26 = arith.constant 0 : index
    %84 = vector.load %arg4[%c0_25, %c0_26] : memref<4x128xf32, #tpu.memory_space<vmem>>, vector<4x128xf32>
    %c0_27 = arith.constant 0 : index
    %c0_28 = arith.constant 0 : index
    %85 = vector.load %arg5[%c0_27, %c0_28] : memref<4x128xf32, #tpu.memory_space<vmem>>, vector<4x128xf32>
    %86 = arith.subf %84, %85 : vector<4x128xf32>
    %87 = math.absf %86 : vector<4x128xf32>
    %88 = vector.shape_cast %87 : vector<4x128xf32> to vector<1x4x128xf32>
    %cst_29 = arith.constant dense<0.000000e+00> : vector<1xf32>
    %89 = vector.multi_reduction <add>, %88, %cst_29 [1, 2] : vector<1x4x128xf32> to vector<1xf32>
    %90 = vector.shape_cast %89 : vector<1xf32> to vector<1x1x1xf32>
    %91 = vector.extract %90[0, 0, 0] : f32 from vector<1x1x1xf32>
    %cst_30 = arith.constant 3.000000e+00 : f32
    %92 = arith.divf %91, %cst_30 : f32
    %93 = vector.extract_strided_slice %84 {offsets = [0, 0], sizes = [1, 128], strides = [1, 1]} : vector<4x128xf32> to vector<1x128xf32>
    %94 = vector.extract_strided_slice %84 {offsets = [1, 0], sizes = [1, 128], strides = [1, 1]} : vector<4x128xf32> to vector<1x128xf32>
    %95 = vector.extract_strided_slice %84 {offsets = [2, 0], sizes = [1, 128], strides = [1, 1]} : vector<4x128xf32> to vector<1x128xf32>
    %96 = vector.extract_strided_slice %84 {offsets = [3, 0], sizes = [1, 128], strides = [1, 1]} : vector<4x128xf32> to vector<1x128xf32>
    %cst_31 = arith.constant 5.000000e-01 : f32
    %97 = vector.broadcast %cst_31 : f32 to vector<1x128xf32>
    %98 = arith.mulf %97, %95 : vector<1x128xf32>
    %99 = arith.subf %93, %98 : vector<1x128xf32>
    %cst_32 = arith.constant 5.000000e-01 : f32
    %100 = vector.broadcast %cst_32 : f32 to vector<1x128xf32>
    %101 = arith.mulf %100, %96 : vector<1x128xf32>
    %102 = arith.subf %94, %101 : vector<1x128xf32>
    %cst_33 = arith.constant 5.000000e-01 : f32
    %103 = vector.broadcast %cst_33 : f32 to vector<1x128xf32>
    %104 = arith.mulf %103, %95 : vector<1x128xf32>
    %105 = arith.addf %93, %104 : vector<1x128xf32>
    %cst_34 = arith.constant 5.000000e-01 : f32
    %106 = vector.broadcast %cst_34 : f32 to vector<1x128xf32>
    %107 = arith.mulf %106, %96 : vector<1x128xf32>
    %108 = arith.addf %94, %107 : vector<1x128xf32>
    %109 = vector.extract_strided_slice %85 {offsets = [0, 0], sizes = [1, 128], strides = [1, 1]} : vector<4x128xf32> to vector<1x128xf32>
    %110 = vector.extract_strided_slice %85 {offsets = [1, 0], sizes = [1, 128], strides = [1, 1]} : vector<4x128xf32> to vector<1x128xf32>
    %111 = vector.extract_strided_slice %85 {offsets = [2, 0], sizes = [1, 128], strides = [1, 1]} : vector<4x128xf32> to vector<1x128xf32>
    %112 = vector.extract_strided_slice %85 {offsets = [3, 0], sizes = [1, 128], strides = [1, 1]} : vector<4x128xf32> to vector<1x128xf32>
    %cst_35 = arith.constant 5.000000e-01 : f32
    %113 = vector.broadcast %cst_35 : f32 to vector<1x128xf32>
    %114 = arith.mulf %113, %111 : vector<1x128xf32>
    %115 = arith.subf %109, %114 : vector<1x128xf32>
    %cst_36 = arith.constant 5.000000e-01 : f32
    %116 = vector.broadcast %cst_36 : f32 to vector<1x128xf32>
    %117 = arith.mulf %116, %112 : vector<1x128xf32>
    %118 = arith.subf %110, %117 : vector<1x128xf32>
    %cst_37 = arith.constant 5.000000e-01 : f32
    %119 = vector.broadcast %cst_37 : f32 to vector<1x128xf32>
    %120 = arith.mulf %119, %111 : vector<1x128xf32>
    %121 = arith.addf %109, %120 : vector<1x128xf32>
    %cst_38 = arith.constant 5.000000e-01 : f32
    %122 = vector.broadcast %cst_38 : f32 to vector<1x128xf32>
    %123 = arith.mulf %122, %112 : vector<1x128xf32>
    %124 = arith.addf %110, %123 : vector<1x128xf32>
    %125 = arith.subf %105, %99 : vector<1x128xf32>
    %126 = arith.subf %108, %102 : vector<1x128xf32>
    %127 = arith.mulf %125, %126 : vector<1x128xf32>
    %128 = arith.subf %121, %115 : vector<1x128xf32>
    %129 = arith.subf %124, %118 : vector<1x128xf32>
    %130 = arith.mulf %128, %129 : vector<1x128xf32>
    %131 = arith.minimumf %105, %121 : vector<1x128xf32>
    %132 = arith.maximumf %99, %115 : vector<1x128xf32>
    %133 = arith.subf %131, %132 : vector<1x128xf32>
    %cst_39 = arith.constant 0.000000e+00 : f32
    %134 = vector.broadcast %cst_39 : f32 to vector<1x128xf32>
    %135 = arith.maximumf %133, %134 : vector<1x128xf32>
    %136 = arith.minimumf %108, %124 : vector<1x128xf32>
    %137 = arith.maximumf %102, %118 : vector<1x128xf32>
    %138 = arith.subf %136, %137 : vector<1x128xf32>
    %cst_40 = arith.constant 0.000000e+00 : f32
    %139 = vector.broadcast %cst_40 : f32 to vector<1x128xf32>
    %140 = arith.maximumf %138, %139 : vector<1x128xf32>
    %141 = arith.mulf %135, %140 : vector<1x128xf32>
    %142 = arith.addf %127, %130 : vector<1x128xf32>
    %143 = arith.subf %142, %141 : vector<1x128xf32>
    %144 = arith.divf %141, %143 : vector<1x128xf32>
    %145 = arith.maximumf %105, %121 : vector<1x128xf32>
    %146 = arith.minimumf %99, %115 : vector<1x128xf32>
    %147 = arith.subf %145, %146 : vector<1x128xf32>
    %148 = arith.maximumf %108, %124 : vector<1x128xf32>
    %149 = arith.minimumf %102, %118 : vector<1x128xf32>
    %150 = arith.subf %148, %149 : vector<1x128xf32>
    %151 = arith.mulf %147, %150 : vector<1x128xf32>
    %152 = arith.subf %151, %143 : vector<1x128xf32>
    %153 = arith.divf %152, %151 : vector<1x128xf32>
    %154 = arith.subf %144, %153 : vector<1x128xf32>
    %cst_41 = arith.constant 1.000000e+00 : f32
    %155 = vector.broadcast %cst_41 : f32 to vector<1x128xf32>
    %156 = arith.subf %155, %154 : vector<1x128xf32>
    %157 = vector.shape_cast %156 : vector<1x128xf32> to vector<1x1x128xf32>
    %cst_42 = arith.constant dense<0.000000e+00> : vector<1xf32>
    %158 = vector.multi_reduction <add>, %157, %cst_42 [1, 2] : vector<1x1x128xf32> to vector<1xf32>
    %159 = vector.shape_cast %158 : vector<1xf32> to vector<1x1x1xf32>
    %160 = vector.extract %159[0, 0, 0] : f32 from vector<1x1x1xf32>
    %cst_43 = arith.constant 3.000000e+00 : f32
    %161 = arith.divf %160, %cst_43 : f32
    %162 = arith.mulf %83, %92 : f32
    %163 = arith.mulf %83, %161 : f32
    %164 = tpu.iota {dimensions = array<i32: 2>} : vector<1x8x128xi32>
    %cst_44 = arith.constant 0.000000e+00 : f32
    %165 = vector.broadcast %cst_44 : f32 to vector<1x8x128xf32>
    %c0_i32_45 = arith.constant 0 : i32
    %166 = vector.broadcast %c0_i32_45 : i32 to vector<1x8x128xi32>
    %167 = arith.cmpi eq, %164, %166 : vector<1x8x128xi32>
    %168 = vector.broadcast %64 : f32 to vector<1x8x128xf32>
    %169 = arith.select %167, %168, %165 : vector<1x8x128xi1>, vector<1x8x128xf32>
    %c1_i32 = arith.constant 1 : i32
    %170 = vector.broadcast %c1_i32 : i32 to vector<1x8x128xi32>
    %171 = arith.cmpi eq, %164, %170 : vector<1x8x128xi32>
    %172 = vector.broadcast %68 : f32 to vector<1x8x128xf32>
    %173 = arith.select %171, %172, %169 : vector<1x8x128xi1>, vector<1x8x128xf32>
    %c2_i32 = arith.constant 2 : i32
    %174 = vector.broadcast %c2_i32 : i32 to vector<1x8x128xi32>
    %175 = arith.cmpi eq, %164, %174 : vector<1x8x128xi32>
    %176 = vector.broadcast %73 : f32 to vector<1x8x128xf32>
    %177 = arith.select %175, %176, %173 : vector<1x8x128xi1>, vector<1x8x128xf32>
    %c3_i32 = arith.constant 3 : i32
    %178 = vector.broadcast %c3_i32 : i32 to vector<1x8x128xi32>
    %179 = arith.cmpi eq, %164, %178 : vector<1x8x128xi32>
    %180 = vector.broadcast %77 : f32 to vector<1x8x128xf32>
    %181 = arith.select %179, %180, %177 : vector<1x8x128xi1>, vector<1x8x128xf32>
    %c4_i32 = arith.constant 4 : i32
    %182 = vector.broadcast %c4_i32 : i32 to vector<1x8x128xi32>
    %183 = arith.cmpi eq, %164, %182 : vector<1x8x128xi32>
    %184 = vector.broadcast %81 : f32 to vector<1x8x128xf32>
    %185 = arith.select %183, %184, %181 : vector<1x8x128xi1>, vector<1x8x128xf32>
    %c5_i32 = arith.constant 5 : i32
    %186 = vector.broadcast %c5_i32 : i32 to vector<1x8x128xi32>
    %187 = arith.cmpi eq, %164, %186 : vector<1x8x128xi32>
    %188 = vector.broadcast %162 : f32 to vector<1x8x128xf32>
    %189 = arith.select %187, %188, %185 : vector<1x8x128xi1>, vector<1x8x128xf32>
    %c6_i32 = arith.constant 6 : i32
    %190 = vector.broadcast %c6_i32 : i32 to vector<1x8x128xi32>
    %191 = arith.cmpi eq, %164, %190 : vector<1x8x128xi32>
    %192 = vector.broadcast %163 : f32 to vector<1x8x128xf32>
    %193 = arith.select %191, %192, %189 : vector<1x8x128xi1>, vector<1x8x128xf32>
    %c0_46 = arith.constant 0 : index
    %c0_47 = arith.constant 0 : index
    %c0_48 = arith.constant 0 : index
    %194 = vector.load %arg6[%c0_46, %c0_47, %c0_48] : memref<1x8x128xf32, #tpu.memory_space<vmem>>, vector<1x8x128xf32>
    tpu.vector_store %arg6[%c0_46, %c0_47, %c0_48], %193 {strides = array<i32>} : memref<1x8x128xf32, #tpu.memory_space<vmem>>, vector<1x8x128xf32>,
    return
  }
  func.func @transform_0(%arg0: i32) -> (i32, i32) {
    %c0_i32 = arith.constant 0 : i32
    %c0_i32_0 = arith.constant 0 : i32
    return %arg0, %c0_i32 : i32, i32
  }
  func.func @transform_1(%arg0: i32) -> (i32, i32) {
    %c0_i32 = arith.constant 0 : i32
    %c0_i32_0 = arith.constant 0 : i32
    return %arg0, %c0_i32 : i32, i32
  }
  func.func @transform_2(%arg0: i32) -> (i32, i32) {
    %c0_i32 = arith.constant 0 : i32
    %c0_i32_0 = arith.constant 0 : i32
    %c0_i32_1 = arith.constant 0 : i32
    return %c0_i32, %c0_i32_0 : i32, i32
  }
  func.func @transform_3(%arg0: i32) -> (i32, i32) {
    %c0_i32 = arith.constant 0 : i32
    %c0_i32_0 = arith.constant 0 : i32
    %c0_i32_1 = arith.constant 0 : i32
    return %c0_i32, %c0_i32_0 : i32, i32
  }
  func.func @transform_4(%arg0: i32) -> (i32, i32) {
    %c0_i32 = arith.constant 0 : i32
    %c0_i32_0 = arith.constant 0 : i32
    %c0_i32_1 = arith.constant 0 : i32
    return %c0_i32, %c0_i32_0 : i32, i32
  }
  func.func @transform_5(%arg0: i32) -> (i32, i32, i32) {
    %c0_i32 = arith.constant 0 : i32
    %c0_i32_0 = arith.constant 0 : i32
    %c0_i32_1 = arith.constant 0 : i32
    return %arg0, %c0_i32, %c0_i32_0 : i32, i32, i32
  }
}

</mosaic_0001>

<bundles_post_ra>
// kernel: tpu_custom_call.1
= control target key start
LH: loop header
LB: loop body
LE: loop exit
PB: predicated region body
PF: predicated region fallthrough
CT: control target
= control target key end

     0   :  { %v43_v1 = vlaneseq  ;;  %v443_v3 = vmov 0   ;;  %v444_v6 = vmov 0.0   ;;  %vm81_vm2 = vcmask 64512   ;;  %s567_s0 = inlined_call_operand.vmem [shape: f32[16,8], index: 0, kind: input, shape index: {}]   ;;  %s568_s1 = inlined_call_operand.vmem [shape: s32[16,1], index: 1, kind: input, shape index: {}]   ;;  %s569_s2 = inlined_call_operand.vmem [shape: f32[1,8], index: 2, kind: input, shape index: {}]   ;;  %s570_s3 = inlined_call_operand.vmem [shape: f32[4,128], index: 3, kind: input, shape index: {}]   ;;  %s571_s4 = inlined_call_operand.vmem [shape: f32[4,128], index: 4, kind: input, shape index: {}]   ;;  %s572_s5 = inlined_call_operand.hbm [shape: f32[1,8,128], index: 5, kind: output, shape index: {}]  }
   0x1   :  { %v482_v0 = vld [vmem:[%s568_s1] sm:$0xff]  ;;  %v487_v2 = vld [vmem:[%s568_s1 + $0x8] sm:$0xff]  ;;  %392 = vset.pattern.permute.xlu0 %v443_v3 }
   0x2   :  { %v21_v4 = vld [vmem:[%s567_s0] sm:$0xff]  ;;  %vm88_vm0 = vcmp.ge.s32.totalorder %v482_v0, 0  ;;  %vm89_vm1 = vcmp.ge.s32.totalorder %v487_v2, 0  ;;  %46 = vperm.xlu0 %392, %v482_v0   ;;  %v495_v5 = vand.u32 127, %v43_v1 }
   0x3   :  { %v368_v7 = vsel %vm88_vm0, 1.0, %v444_v6  ;;  %v369_v8 = vsel %vm89_vm1, 1.0, %v444_v6 }
   0x4   :  { %v393_v9 = vpack.i.bf16 %v369_v8, %v368_v7 }
   0x5   :  { %10 = vsyncpa [#allocation3], 0  ;;  %vm108_vm3 = vcmp.lt.s32.totalorder %v495_v5, 7  ;;  %s445_s1 = smov 7   ;;  %v22_v12 = vld [vmem:[%s567_s0 + $0x8] sm:$0xff]  ;;  %v25_v26 = vmax.f32 %v21_v4, 0.0 }
   0x6   :  { %v109_v10 = vsel %vm108_vm3, %v21_v4, -3.4028235e+38  ;;  %394 = vrot.lane.b32.xlu2 %v393_v9, %s445_s1  ;;  %v110_v13 = vsel %vm108_vm3, %v22_v12, -3.4028235e+38  ;;  %v27_v15 = vand.u32 2147483647, %v21_v4 }
   0x7   :  { %v111_v11 = vsel %vm81_vm2, %v109_v10, -inf  ;;  %v114_v14 = vsel %vm81_vm2, %v110_v13, -inf  ;;  %v28_v18 = vand.u32 2147483647, %v22_v12  ;;  %v26_v36 = vmax.f32 %v22_v12, 0.0  ;;  %s446_s27 = smov 121  }
   0x8   :  { %112 = vmax.xlane.f32.xlu1 %v111_v11  ;;  %v29_v16 = vsub.f32 0.0, %v27_v15  ;;  %v398_v38 = vld [vmem:[%s569_s2] ss:$0 sm:$0xff]  ;;  %vm133_vm8 = vcmask 7168   ;;  %vm90_vm9 = vcmp.lt.s32.totalorder %v482_v0, 8  ;;  %vm91_vm10 = vcmp.lt.s32.totalorder %v487_v2, 8 }
   0x9   :  { %v30_v19 = vsub.f32 0.0, %v28_v18  ;;  %v206_v9 = vld [vmem:[%s570_s3] sm:$0xf]  ;;  %vm92_vm11 = vmand %vm88_vm0, %vm90_vm9  ;;  %vm98_vm13 = vcmp.eq.s32.totalorder %v482_v0, 8  ;;  %vm99_vm14 = vcmp.eq.s32.totalorder %v487_v2, 8  ;;  %vm210_vm15 = vcmask 1043456  }
   0xa   :  { %49 = vperm.xlu0 %392, %v487_v2   ;;  %v31_v17 = vmul.f32 1.442695, %v29_v16  ;;  %v207_v10 = vld [vmem:[%s571_s4] sm:$0xf]  ;;  %v230_v11 = vmul.f32 0.5, %v206_v9  ;;  %vm93_vm12 = vmand %vm89_vm1, %vm91_vm10  ;;  %v534_v13 = vsel %vm92_vm11, 1.0, %v444_v6 }
   0xb   :  { %v33_v20 = vmul.f32 1.442695, %v30_v19  ;;  %v146_v15 = vsel %vm133_vm8, %v534_v13, 0.0  ;;  %v208_v0 = vsub.f32 %v206_v9, %v207_v10  ;;  %vm302_vm9 = vcmask 1040384   ;;  %s353_s14 = sshll.u32 %s572_s5, 4  ;;  %s448_s16 = smov [#allocation2]   ;;  %s354_s14 = int_to_ptr.hbm [resolvable:$true] %s353_s14 }
   0xc   :  { %399 = vpow2.f32 %v31_v17  ;;  %v232_v16 = vrot.slane %v230_v11, 2  ;;  %vm324_vm10 = vcmp.eq.s32.totalorder %v495_v5, 0  ;;  %vm327_vm11 = vcmp.eq.s32.totalorder %v495_v5, 1  ;;  %s351_s17 = sshll.u32 %s448_s16, 4  ;;  %s352_s17 = int_to_ptr.vmem [resolvable:$true] %s351_s17 }
   0xd   :  { %401 = vpow2.f32 %v33_v20 }
   0xe   :  { %v234_v20 = vsub.f32 %v206_v9, %v232_v16 }
  0x10   :  { %115 = vmax.xlane.f32.xlu1 %v114_v14  ;;  %v537_v14 = vsel %vm93_vm12, 1.0, %v444_v6  ;;  %vm330_vm12 = vcmp.eq.s32.totalorder %v495_v5, 2 }
  0x11   :  { %v147_v18 = vsel %vm133_vm8, %v537_v14, 0.0 }
  0x12   :  { %v400_v21 = vpop.eup %399  ;;  %v148_v19 = vadd.f32 %v147_v18, %v146_v15 }
  0x13   :  { %v35_v22 = vadd.f32 1.0, %v400_v21  ;;  %v402_v23 = vpop.eup %401  ;;  %v235_v21 = vadd.f32 %v232_v16, %v206_v9 }
  0x14   :  { %v36_v24 = vadd.f32 1.0, %v402_v23 }
  0x15   :  { %403 = vlog2.f32 %v35_v22 }
  0x16   :  { %405 = vlog2.f32 %v36_v24 }
  0x1b   :  { %v404_v25 = vpop.eup %403 }
  0x1c   :  { %v38_v27 = vmul.f32 0.6931472, %v404_v25  ;;  %v406_v30 = vpop.eup %405 }
  0x1d   :  { %v40_v37 = vmul.f32 0.6931472, %v406_v30 }
  0x1e   :  { %v41_v29 = vadd.f32 %v38_v27, %v25_v26  ;;  %v242_v26 = vsub.f32 %v235_v21, %v234_v20 }
  0x1f   :  { %v42_v44 = vadd.f32 %v40_v37, %v26_v36 }
  0x60   :  { %v395_v32 = vpop.permute.xlu2 %394 }
  0x61   :  { %v396_v35 = vunpack.i.l.bf16 %v395_v32  ;;  %v397_v49 = vunpack.i.h.bf16 %v395_v32 }
  0x74   :  { %v47_v28 = vpop.permute.xlu0 %46 }
  0x75   :  { %vm51_vm4 = vcmp.eq.s32.totalorder %v495_v5, %v47_v28 }
  0x76   :  { %v362_v31 = vsel %vm51_vm4, 1.0, %v444_v6 }
  0x77   :  { %v57_v33 = vmul.f32 %v362_v31, %v21_v4  ;;  %v244_v31 = vrot.slane %v242_v26, 1 }
  0x79   :  { %v59_v34 = vsub.f32 %v41_v29, %v57_v33 }
  0x7b   :  { %v113_v39 = vpop.xlane.xlu1 %112  ;;  %v61_v40 = vmin.f32 %v59_v34, 100.0 }
  0x7c   :  { %vm117_vm5 = vcmp.ge.f32.partialorder %v113_v39, %v21_v4  ;;  %v50_v42 = vpop.permute.xlu0 %49 }
  0x7d   :  { %v119_v41 = vsel %vm117_vm5, 1.0, %v444_v6  ;;  %vm52_vm6 = vcmp.eq.s32.totalorder %v495_v5, %v50_v42  ;;  %v67_v45 = vmul.f32 %v398_v38, %v61_v40 }
  0x7e   :  { %v129_v43 = vmul.f32 %v396_v35, %v119_v41  ;;  %v363_v46 = vsel %vm52_vm6, 1.0, %v444_v6  ;;  %v246_v35 = vmul.f32 %v244_v31, %v242_v26  ;;  %v366_v41 = vsel %vm98_vm13, 1.0, %v444_v6 }
  0x7f   :  { %v58_v47 = vmul.f32 %v363_v46, %v22_v12  ;;  %v69_v48 = vsub.f32 0.0, %v67_v45  ;;  %v172_v42 = vsel %vm133_vm8, %v366_v41, 0.0  ;;  %vm333_vm13 = vcmp.eq.s32.totalorder %v495_v5, 3 }
  0x80   :  { %186 = vrot.lane.b32.xlu1 %v129_v43, %s446_s27  ;;  %v367_v43 = vsel %vm99_vm14, 1.0, %v444_v6  ;;  %vm336_vm14 = vcmp.eq.s32.totalorder %v495_v5, 4 }
  0x81   :  { %v60_v50 = vsub.f32 %v42_v44, %v58_v47  ;;  %v71_v51 = vmul.f32 1.442695, %v69_v48 }
  0x83   :  { %v116_v52 = vpop.xlane.xlu1 %115  ;;  %v62_v53 = vmin.f32 %v60_v50, 100.0  ;;  %407 = vpow2.f32 %v71_v51 }
  0x84   :  { %vm118_vm7 = vcmp.ge.f32.partialorder %v116_v52, %v22_v12  ;;  %v236_v12 = vmul.f32 0.5, %v207_v10 }
  0x85   :  { %v120_v54 = vsel %vm118_vm7, 1.0, %v444_v6  ;;  %v68_v56 = vmul.f32 %v398_v38, %v62_v53 }
  0x86   :  { %v130_v55 = vmul.f32 %v397_v49, %v120_v54  ;;  %v238_v17 = vrot.slane %v236_v12, 2  ;;  %v209_v49 = vand.u32 2147483647, %v208_v0 }
  0x87   :  { %v70_v57 = vsub.f32 0.0, %v68_v56 }
  0x88   :  { %188 = vrot.lane.b32.xlu1 %v130_v55, %s446_s27  ;;  %v240_v22 = vsub.f32 %v207_v10, %v238_v17  ;;  %v241_v23 = vadd.f32 %v238_v17, %v207_v10  ;;  %v211_v52 = vsel %vm210_vm15, %v209_v49, 0.0  ;;  %vm339_vm15 = vcmp.eq.s32.totalorder %v495_v5, 5 }
  0x89   :  { %v408_v58 = vpop.eup %407  ;;  %v73_v59 = vmul.f32 1.442695, %v70_v57 }
  0x8a   :  { %v75_v60 = vsub.f32 1.0, %v408_v58  ;;  %v253_v24 = vmax.f32 %v234_v20, %v240_v22  ;;  %v252_v25 = vmin.f32 %v235_v21, %v241_v23  ;;  %v247_v27 = vsub.f32 %v241_v23, %v240_v22 }
  0x8b   :  { %409 = vpow2.f32 %v73_v59  ;;  %v277_v29 = vmax.f32 %v235_v21, %v241_v23  ;;  %v278_v30 = vmin.f32 %v234_v20, %v240_v22 }
  0x8c   :  { %v77_v61 = vmul.f32 %v75_v60, %v75_v60  ;;  %v254_v28 = vsub.f32 %v252_v25, %v253_v24  ;;  %v249_v32 = vrot.slane %v247_v27, 1 }
  0x8d   :  { %v279_v34 = vsub.f32 %v277_v29, %v278_v30 }
  0x8e   :  { %v79_v62 = vmul.f32 %v77_v61, %v67_v45  ;;  %v255_v33 = vmax.f32 %v254_v28, 0.0  ;;  %v251_v36 = vmul.f32 %v249_v32, %v247_v27  ;;  %v173_v45 = vsel %vm133_vm8, %v367_v43, 0.0 }
  0x8f   :  { %v281_v38 = vrot.slane %v279_v34, 1  ;;  %v174_v47 = vadd.f32 %v173_v45, %v172_v42 }
  0x90   :  { %v82_v63 = vsel %vm81_vm2, %v79_v62, 0.0  ;;  %v257_v37 = vrot.slane %v255_v33, 1  ;;  %v260_v40 = vadd.f32 %v251_v36, %v246_v35 }
  0x91   :  { %v410_v1 = vpop.eup %409  ;;  %83 = vadd.xlane.f32.xlu2 %v82_v63  ;;  %v283_v44 = vmul.f32 %v281_v38, %v279_v34  ;;  %v447_v34 = vmov 3.0  }
  0x92   :  { %v76_v3 = vsub.f32 1.0, %v410_v1  ;;  %v259_v39 = vmul.f32 %v257_v37, %v255_v33 }
  0x93   :  { %411 = vrcp.f32 %v283_v44  ;;  %v296_v62 = vand.u32 2147483648, %v283_v44 }
  0x94   :  { %v78_v4 = vmul.f32 %v76_v3, %v76_v3  ;;  %v261_v46 = vsub.f32 %v260_v40, %v259_v39 }
  0x96   :  { %v80_v7 = vmul.f32 %v78_v4, %v68_v56  ;;  %413 = vrcp.f32 %v261_v46  ;;  %vm267_vm0 = vweird.f32 %v261_v46  ;;  %v273_v61 = vand.u32 2147483648, %v261_v46 }
  0x97   :  { %v271_v1 = vand.u32 2147483647, %v261_v46  ;;  %v294_v4 = vand.u32 2147483647, %v283_v44  ;;  %v284_v11 = vsub.f32 %v283_v44, %v261_v46  ;;  %415 = vrcp.f32 %v447_v34 }
  0x98   :  { %v85_v8 = vsel %vm81_vm2, %v80_v7, 0.0  ;;  %vm290_vm2 = vweird.f32 %v283_v44  ;;  %v274_v7 = vor.u32 1.1754944e-38, %v273_v61 }
  0x99   :  { %86 = vadd.xlane.f32.xlu0 %v85_v8  ;;  %149 = vadd.xlane.f32.xlu2 %v148_v19  ;;  %v412_v48 = vpop.eup %411  ;;  %v297_v8 = vor.u32 1.1754944e-38, %v296_v62  ;;  %vm272_vm6 = vcmp.eq.f32.partialorder %v271_v1, 8.507059e+37  ;;  %vm295_vm7 = vcmp.eq.f32.partialorder %v294_v4, 8.507059e+37 }
  0x9a   :  { %v286_v53 = vmul.f32 %v412_v48, %v283_v44  ;;  %vm291_vm3 = vweird.f32 %v412_v48 }
  0x9b   :  { %vm292_vm5 = vmor %vm290_vm2, %vm291_vm3 }
  0x9c   :  { %v414_v50 = vpop.eup %413  ;;  %v287_v55 = vsub.f32 1.0, %v286_v53 }
  0x9d   :  { %v263_v2 = vmul.f32 %v414_v50, %v261_v46  ;;  %vm268_vm1 = vweird.f32 %v414_v50 }
  0x9e   :  { %v288_v60 = vmul.f32 %v412_v48, %v287_v55  ;;  %vm269_vm4 = vmor %vm267_vm0, %vm268_vm1  ;;  %vm342_vm0 = vcmp.eq.s32.totalorder %v495_v5, 6 }
  0x9f   :  { %v264_v54 = vsub.f32 1.0, %v263_v2 }
  0xa0   :  { %v289_v3 = vadd.f32 %v412_v48, %v288_v60 }
  0xa1   :  { %175 = vadd.xlane.f32.xlu0 %v174_v47  ;;  %v265_v59 = vmul.f32 %v414_v50, %v264_v54 }
  0xa2   :  { %v293_v10 = vsel %vm292_vm5, %v412_v48, %v289_v3 }
  0xa3   :  { %v266_v63 = vadd.f32 %v414_v50, %v265_v59  ;;  %v298_v15 = vsel %vm295_vm7, %v297_v8, %v293_v10 }
  0xa4   :  { %v299_v18 = vmul.f32 %v298_v15, %v284_v11 }
  0xa5   :  { %v270_v9 = vsel %vm269_vm4, %v414_v50, %v266_v63 }
  0xa6   :  { %v275_v12 = vsel %vm272_vm6, %v274_v7, %v270_v9 }
  0xa7   :  { %v276_v17 = vmul.f32 %v275_v12, %v259_v39 }
  0xa9   :  { %212 = vadd.xlane.f32.xlu0 %v211_v52  ;;  %v300_v24 = vsub.f32 %v276_v17, %v299_v18 }
  0xab   :  { %v301_v31 = vsub.f32 1.0, %v300_v24 }
  0xf2   :  { %v187_v51 = vpop.permute.xlu1 %186 }
  0xf3   :  { %v192_v6 = vsel %vm133_vm8, %v187_v51, 0.0 }
  0xfa   :  { %v189_v56 = vpop.permute.xlu1 %188 }
  0xfb   :  { %v193_v57 = vsel %vm133_vm8, %v189_v56, 0.0 }
  0xfc   :  { %v194_v58 = vadd.f32 %v193_v57, %v192_v6 }
  0xfe   :  { %195 = vadd.xlane.f32.xlu2 %v194_v58 }
 0x104   :  { %v84_v16 = vpop.xlane.xlu2 %83 }
 0x105   :  { %v131_v19 = vmul.f32 %v534_v13, %v84_v16  ;;  %v158_v20 = vmul.f32 %v366_v41, %v84_v16  ;;  %v303_v13 = vsel %vm302_vm9, %v301_v31, 0.0  ;;  %v416_v41 = vpop.eup %415 }
 0x106   :  { %v222_v0 = vmul.f32 3.0, %v416_v41 }
 0x107   :  { %v160_v25 = vsel %vm133_vm8, %v158_v20, 0.0  ;;  %v134_v27 = vsel %vm133_vm8, %v131_v19, 0.0 }
 0x108   :  { %v223_v54 = vsub.f32 1.0, %v222_v0 }
 0x10a   :  { %v224_v1 = vmul.f32 %v416_v41, %v223_v54 }
 0x10c   :  { %v87_v21 = vpop.xlane.xlu0 %86  ;;  %v225_v17 = vadd.f32 %v416_v41, %v224_v1 }
 0x10d   :  { %v132_v22 = vmul.f32 %v537_v14, %v87_v21  ;;  %v159_v23 = vmul.f32 %v367_v43, %v87_v21  ;;  %v150_v14 = vpop.xlane.xlu2 %149 }
 0x10e   :  { %v151_v35 = vrot.slane %v150_v14, 4 }
 0x10f   :  { %v161_v26 = vsel %vm133_vm8, %v159_v23, 0.0  ;;  %v135_v28 = vsel %vm133_vm8, %v132_v22, 0.0  ;;  %vm226_vm8 = vweird.f32 %v416_v41 }
 0x110   :  { %v162_v29 = vadd.f32 %v161_v26, %v160_v25  ;;  %v136_v30 = vadd.f32 %v135_v28, %v134_v27  ;;  %v152_v40 = vadd.f32 %v151_v35, %v150_v14  ;;  %v227_v23 = vsel %vm226_vm8, %v416_v41, %v225_v17 }
 0x112   :  { %163 = vadd.xlane.f32.xlu2 %v162_v29  ;;  %137 = vadd.xlane.f32.xlu1 %v136_v30  ;;  %v153_v45 = vrot.slane %v152_v40, 2 }
 0x114   :  { %v176_v32 = vpop.xlane.xlu0 %175  ;;  %v154_v6 = vadd.f32 %v153_v45, %v152_v40 }
 0x115   :  { %v177_v37 = vrot.slane %v176_v32, 4 }
 0x116   :  { %v155_v63 = vrot.slane %v154_v6, 1 }
 0x117   :  { %v178_v42 = vadd.f32 %v177_v37, %v176_v32 }
 0x118   :  { %v156_v16 = vadd.f32 %v155_v63, %v154_v6 }
 0x119   :  { %v179_v50 = vrot.slane %v178_v42, 2 }
 0x11a   :  { %304 = vadd.xlane.f32.xlu2 %v303_v13 }
 0x11b   :  { %v180_v58 = vadd.f32 %v179_v50, %v178_v42 }
 0x11c   :  { %v213_v33 = vpop.xlane.xlu0 %212 }
 0x11d   :  { %v214_v38 = vrot.slane %v213_v33, 4  ;;  %v181_v8 = vrot.slane %v180_v58, 1 }
 0x11f   :  { %v215_v43 = vadd.f32 %v214_v38, %v213_v33  ;;  %v182_v19 = vadd.f32 %v181_v8, %v180_v58 }
 0x121   :  { %v216_v51 = vrot.slane %v215_v43, 2 }
 0x123   :  { %v217_v57 = vadd.f32 %v216_v51, %v215_v43 }
 0x125   :  { %v218_v9 = vrot.slane %v217_v57, 1 }
 0x127   :  { %v219_v20 = vadd.f32 %v218_v9, %v217_v57 }
 0x171   :  { %v196_v36 = vpop.xlane.xlu2 %195 }
 0x172   :  { %v197_v39 = vrot.slane %v196_v36, 4 }
 0x174   :  { %v198_v44 = vadd.f32 %v197_v39, %v196_v36 }
 0x176   :  { %v199_v52 = vrot.slane %v198_v44, 2 }
 0x178   :  { %v200_v61 = vadd.f32 %v199_v52, %v198_v44 }
 0x17a   :  { %v201_v15 = vrot.slane %v200_v61, 1 }
 0x17c   :  { %v202_v22 = vadd.f32 %v201_v15, %v200_v61 }
 0x185   :  { %v138_v46 = vpop.xlane.xlu1 %137  ;;  %v164_v47 = vpop.xlane.xlu2 %163 }
 0x186   :  { %v139_v48 = vrot.slane %v138_v46, 4  ;;  %v165_v49 = vrot.slane %v164_v47, 4 }
 0x188   :  { %v140_v2 = vadd.f32 %v139_v48, %v138_v46  ;;  %v166_v53 = vadd.f32 %v165_v49, %v164_v47 }
 0x18a   :  { %v141_v55 = vrot.slane %v140_v2, 2  ;;  %v167_v56 = vrot.slane %v166_v53, 2 }
 0x18c   :  { %v142_v59 = vadd.f32 %v141_v55, %v140_v2  ;;  %v168_v60 = vadd.f32 %v167_v56, %v166_v53 }
 0x18d   :  { %v305_v62 = vpop.xlane.xlu2 %304 }
 0x18e   :  { %v306_v3 = vrot.slane %v305_v62, 4  ;;  %v143_v4 = vrot.slane %v142_v59, 1  ;;  %v169_v7 = vrot.slane %v168_v60, 1 }
 0x190   :  { %v307_v10 = vadd.f32 %v306_v3, %v305_v62  ;;  %v144_v11 = vadd.f32 %v143_v4, %v142_v59  ;;  %v170_v12 = vadd.f32 %v169_v7, %v168_v60 }
 0x192   :  { %v308_v18 = vrot.slane %v307_v10, 2  ;;  %370 = vpush %v144_v11 }
 0x193   :  { %372 = vpush %v156_v16 }
 0x194   :  { %v309_v21 = vadd.f32 %v308_v18, %v307_v10  ;;  %374 = vpush %v170_v12 }
 0x195   :  { %376 = vpush %v182_v19 }
 0x196   :  { %378 = vpush %v202_v22  ;;  %v310_v24 = vrot.slane %v309_v21, 1 }
 0x197   :  { %380 = vpush %v219_v20 }
 0x198   :  { %382 = vpush %v227_v23  ;;  %v311_v25 = vadd.f32 %v310_v24, %v309_v21 }
 0x19a   :  { %384 = vpush %v311_v25 }
 0x1c3   :  { %s371_s3 = spop %370 }
 0x1c4   :  { %v325_v26 = vstv %s371_s3  ;;  %s373_s4 = spop %372 }
 0x1c5   :  { %v326_v27 = vsel %vm324_vm10, %v325_v26, 0.0  ;;  %v328_v28 = vstv %s373_s4  ;;  %s375_s6 = spop %374 }
 0x1c6   :  { %v329_v29 = vsel %vm327_vm11, %v328_v28, %v326_v27  ;;  %v331_v30 = vstv %s375_s6  ;;  %s377_s7 = spop %376 }
 0x1c7   :  { %v332_v31 = vsel %vm330_vm12, %v331_v30, %v329_v29  ;;  %v334_v13 = vstv %s377_s7  ;;  %s379_s8 = spop %378 }
 0x1c8   :  { %v335_v32 = vsel %vm333_vm13, %v334_v13, %v332_v31  ;;  %s381_s9 = spop %380  ;;  %v337_v14 = vstv %s379_s8 }
 0x1c9   :  { %s383_s10 = spop %382  ;;  %v338_v33 = vsel %vm336_vm14, %v337_v14, %v335_v32 }
 0x1ca   :  { %s229_s11 = smul.f32 %s383_s10, %s381_s9 }
 0x1cb   :  { %s385_s15 = spop %384 }
 0x1cc   :  { %s321_s18 = smul.f32 %s385_s15, %s383_s10  ;;  %v340_v34 = vstv %s229_s11 }
 0x1cd   :  { %v341_v35 = vsel %vm339_vm15, %v340_v34, %v338_v33 }
 0x1ce   :  { %v343_v36 = vstv %s321_s18 }
 0x1cf   :  { %v344_v37 = vsel %vm342_vm0, %v343_v36, %v341_v35 }
 0x1d0   :  { %345 = vst [vmem:[#allocation2] sm:$0xff] %v344_v37 }
 0x1d1   :  { %356 = dma.vmem_to_hbm [thread:$0]  %s352_s17, 128, %s354_s14, [#allocation3]  }
 0x1d2   :  { %441 = dma.done.wait [#allocation3], 128  }
 0x1d3   :  { %442 = vsyncadd [#allocation3], 4294967168 }
 0x1d4   :  { %361 = vsyncpa [#allocation3], 1 }

</bundles_post_ra>
